<compile_context>
chip_gen: v5e
topology: v5e:2x2
jax: 0.10.0
libtpu: 0.0.40
codegen_flags: <defaults>
</compile_context>

<pallas_src>
import jax
import jax.numpy as jnp
from jax.experimental import pallas as pl
from jax.experimental.pallas import tpu as pltpu


# ----------------------------------------------------------------------------
# Kernel
# ----------------------------------------------------------------------------
def _pool_kernel(ab_ref, x_ref, out_ref):
    # ab_ref : SMEM (2,) f32 -> [alpha / V, beta]   (mean's 1/V folded in)
    # x_ref  : VMEM (tile_b, V, tile_f) feature tile (input dtype)
    # out_ref: VMEM (tile_b, tile_f)    pooled tile  (input dtype)
    V = x_ref.shape[1]
    x0 = x_ref[:, 0, :]                       # (tile_b, tile_f) slice, VPU path
    max_acc = x0                              # max is exact in the input dtype
    sum_acc = x0.astype(jnp.float32)          # sum accumulated in f32
    for v in range(1, V):                     # unrolled elementwise reduce over V
        xv = x_ref[:, v, :]
        max_acc = jnp.maximum(max_acc, xv)
        sum_acc = sum_acc + xv.astype(jnp.float32)
    pooled = ab_ref[0] * sum_acc + ab_ref[1] * max_acc.astype(jnp.float32)
    out_ref[...] = jnp.maximum(pooled, 0.0).astype(out_ref.dtype)   # ReLU


# ----------------------------------------------------------------------------
# Tiling / budgeting helpers
# ----------------------------------------------------------------------------
def _divisors_desc(n):
    ds = set()
    i = 1
    while i * i <= n:
        if n % i == 0:
            ds.add(i)
            ds.add(n // i)
        i += 1
    return sorted(ds, reverse=True)


def _f_tiles(F):
    """Lane-axis tiles: prefer full F; if splitting, require multiples of 128 >= 512."""
    if F % 128 != 0:
        return [F]
    tiles = [F]
    for d in _divisors_desc(F):
        if d < F and d % 128 == 0 and d >= 512:
            tiles.append(d)
    return tiles


def _b_tiles(B_arr):
    """Legal output-sublane tiles (descending) for an output array with first dim B_arr."""
    tiles = {B_arr}                            # full extent is always legal
    for d in _divisors_desc(B_arr):
        if d % 8 == 0:
            tiles.add(d)
    return sorted(tiles, reverse=True)


def _step_bytes(tb, tf, V, in_bytes, out_bytes):
    """Per-grid-step VMEM footprint: double-buffered blocks + in-kernel temps + padding."""
    sub_in = 8 * max(1, 4 // in_bytes)         # sublane packing: f32 -> 8, bf16 -> 16
    sub_out = 8 * max(1, 4 // out_bytes)
    Vp = -(-V // sub_in) * sub_in
    tfp = -(-tf // 128) * 128
    tbp = -(-tb // sub_out) * sub_out
    in_blk = tb * Vp * tfp * in_bytes
    out_blk = tbp * tfp * out_bytes
    # f32 slice upcast + f32 sum acc + f32 pooled, plus max acc + slice in input dtype.
    temps = tbp * tfp * (3 * 4 + 2 * in_bytes)
    return 2 * in_blk + 2 * out_blk + temps


def _vmem_budgets():
    """Generation-aware (vmem_limit_bytes, per-step block budget)."""
    phys = 64 << 20                            # conservative fallback (v7x per-TC VMEM)
    try:
        info = pltpu.get_tpu_info()
        cap = int(getattr(info, "vmem_capacity_bytes", 0) or 0)
        if cap > 0:
            phys = cap
    except Exception:
        pass
    vmem_limit = min((phys * 3) // 4, 96 << 20)        # 96 MiB v5e/v6e, 48 MiB v7x
    step_budget = min((vmem_limit * 2) // 3, phys // 2)  # 64 MiB v5e/v6e, 32 MiB v7x
    return vmem_limit, step_budget


def _pick_tiles(B, V, F, in_bytes, out_bytes, budget):
    """Largest (tile_b, tile_f, padded_B) whose per-step footprint fits the budget.
    Prefers full-F tiles (contiguous DMA rows); splits / pads B before splitting F."""
    f_tiles = _f_tiles(F)
    # Pass 1: no B padding.
    for tf in f_tiles:
        for tb in _b_tiles(B):
            if _step_bytes(tb, tf, V, in_bytes, out_bytes) <= budget:
                return tb, tf, B
    # Pass 2: pad B to a multiple of 8 so small multiple-of-8 B tiles become legal.
    Bp = -(-B // 8) * 8
    for tf in f_tiles:
        for tb in _b_tiles(Bp):
            if _step_bytes(tb, tf, V, in_bytes, out_bytes) <= budget:
                return tb, tf, Bp
    # Fallback: smallest legal tiles.
    return min(8, Bp), f_tiles[-1], Bp


def _maybe_split_for_megacore(tile_b, tile_f, Bp, B, V, F, in_bytes, out_bytes, budget):
    """Ensure >= 2 B-tile grid steps on sizeable problems (v7x has 2 TensorCores)."""
    if Bp // tile_b >= 2:
        return tile_b, Bp
    if B < 16 or B * V * F * in_bytes < (4 << 20):
        return tile_b, Bp                       # too small for a split to pay off
    cand_Bp = -(-B // 8) * 8
    for tb in _b_tiles(cand_Bp):
        if tb < cand_Bp and cand_Bp // tb >= 2 and \
           _step_bytes(tb, tile_f, V, in_bytes, out_bytes) <= budget:
            return tb, cand_Bp
    return tile_b, Bp


# ----------------------------------------------------------------------------
# Wrapper
# ----------------------------------------------------------------------------
def view_max_mean_alpha_aggregate(aux, alpha, beta, *, tile_b=None, tile_f=None):
    """Pallas implementation of ViewMaxMeanAlphaAggregate.forward(mvimages, aux=True).

    aux: (B, V, F) per-view features. Returns (pooled_view.squeeze(), aux).
    """
    B, V, F = aux.shape
    in_bytes = aux.dtype.itemsize
    out_bytes = in_bytes

    vmem_limit, step_budget = _vmem_budgets()

    auto_b, auto_f, Bp = _pick_tiles(B, V, F, in_bytes, out_bytes, step_budget)
    auto_b, Bp = _maybe_split_for_megacore(
        auto_b, auto_f, Bp, B, V, F, in_bytes, out_bytes, step_budget)

    if tile_b is not None:
        Bp = B                                  # explicit tile_b -> no B padding
        assert B % tile_b == 0 and (tile_b % 8 == 0 or tile_b == B), \
            "tile_b must divide B and be a multiple of 8 (or equal B)"
    else:
        tile_b = auto_b
    if tile_f is not None:
        assert F % tile_f == 0 and (tile_f % 128 == 0 or tile_f == F), \
            "tile_f must divide F and be a multiple of 128 (or equal F)"
    else:
        tile_f = auto_f

    x = aux
    if Bp != B:
        x = jnp.pad(aux, ((0, Bp - B), (0, 0), (0, 0)))

    assert Bp % tile_b == 0 and F % tile_f == 0
    grid = (Bp // tile_b, F // tile_f)

    # Fold mean's 1/V and alpha into one scalar: alpha*mean + beta*max
    # == (alpha/V)*sum + beta*max.
    ab = jnp.stack([jnp.asarray(alpha, jnp.float32) / jnp.float32(V),
                    jnp.asarray(beta, jnp.float32)]).reshape(2)

    cost = pl.CostEstimate(
        flops=3 * Bp * V * F,                                   # max + sum + blend
        bytes_accessed=Bp * V * F * in_bytes + Bp * F * out_bytes + 8,
        transcendentals=0)

    pooled = pl.pallas_call(
        _pool_kernel,
        out_shape=jax.ShapeDtypeStruct((Bp, F), aux.dtype),
        grid=grid,
        in_specs=[
            # alpha/V, beta live in SMEM (scalars), passed untiled.
            pl.BlockSpec(memory_space=pltpu.MemorySpace.SMEM),
            # (tile_b, full V, tile_f) feature block per grid step.
            pl.BlockSpec((tile_b, V, tile_f), lambda i, j: (i, 0, j)),
        ],
        out_specs=pl.BlockSpec((tile_b, tile_f), lambda i, j: (i, j)),
        compiler_params=pltpu.CompilerParams(
            dimension_semantics=("parallel", "parallel"),
            vmem_limit_bytes=vmem_limit),
        cost_estimate=cost,
    )(ab, x)

    if Bp != B:
        pooled = pooled[:B]

    # torch's .squeeze(): drop any size-1 dims (no-op for B>1, F>1).
    return jnp.squeeze(pooled), aux


# ----------------------------------------------------------------------------
# Self-test
# ----------------------------------------------------------------------------
if __name__ == "__main__":
    key = jax.random.PRNGKey(0)
    k_x, k_p = jax.random.split(key)

    # Small shapes: batch=2, views=8, feature dim=256.
    B, V, F = 2, 8, 256
    aux_in = jax.random.normal(k_x, (B, V, F), dtype=jnp.float32)

    # Deterministic parameter init mirroring __init__:
    #   random_value = torch.rand(1); alpha = r; beta = 1 - r
    r = jax.random.uniform(k_p, ())
    alpha = r
    beta = 1.0 - r

    # Pure-JAX reference of the forward semantics.
    ref = jnp.maximum(
        alpha * jnp.mean(aux_in, axis=1) + beta * jnp.max(aux_in, axis=1), 0.0)

    # 1) Auto-tiled path (tiny problem -> single block, no forced split).
    pooled, aux_out = view_max_mean_alpha_aggregate(aux_in, alpha, beta)
    pooled = jax.block_until_ready(pooled)
    assert pooled.shape == (B, F)
    assert aux_out.shape == (B, V, F)
    assert jnp.allclose(pooled, ref, atol=1e-5, rtol=1e-5)

    # 2) Explicit small tiles: exercises the multi-step 2-D (B, F) grid path.
    pooled_tiled, _ = view_max_mean_alpha_aggregate(
        aux_in, alpha, beta, tile_b=2, tile_f=128)
    pooled_tiled = jax.block_until_ready(pooled_tiled)
    assert jnp.allclose(pooled_tiled, ref, atol=1e-5, rtol=1e-5)

    # 3) bf16 inputs (halves HBM bytes); f32 sum accumulation in-kernel,
    #    max computed exactly in bf16.
    aux_bf16 = aux_in.astype(jnp.bfloat16)
    pooled_bf16, _ = view_max_mean_alpha_aggregate(aux_bf16, alpha, beta)
    pooled_bf16 = jax.block_until_ready(pooled_bf16)
    ref_bf16 = jnp.maximum(
        alpha * jnp.mean(aux_bf16.astype(jnp.float32), axis=1)
        + beta * jnp.max(aux_bf16.astype(jnp.float32), axis=1), 0.0)
    assert jnp.allclose(pooled_bf16.astype(jnp.float32), ref_bf16,
                        atol=2e-2, rtol=2e-2)

    print("KERNEL_OK")
</pallas_src>

<mosaic_0001>
module attributes {stable_mosaic.version = 11 : i64} {
  func.func @_pool_kernel(%arg0: i32, %arg1: i32, %arg2: memref<2xf32, #tpu.memory_space<smem>>, %arg3: memref<2x8x256xf32, #tpu.memory_space<vmem>>, %arg4: memref<2x256xf32, #tpu.memory_space<vmem>>) attributes {dimension_semantics = [#tpu.dimension_semantics<parallel>, #tpu.dimension_semantics<parallel>], iteration_bounds = array<i64: 1, 1>, scalar_prefetch = 0 : i64, scratch_operands = 0 : i64, tpu.core_type = #tpu.core_type<tc>, window_params = [{transform_indices = @transform_0, window_bounds = array<i64: 2>}, {transform_indices = @transform_1, window_bounds = array<i64: 2, 8, 256>}, {transform_indices = @transform_2, window_bounds = array<i64: 2, 256>}]} {
    %c0 = arith.constant 0 : index
    %c0_0 = arith.constant 0 : index
    %c0_1 = arith.constant 0 : index
    %0 = vector.load %arg3[%c0, %c0_0, %c0_1] : memref<2x8x256xf32, #tpu.memory_space<vmem>>, vector<2x1x256xf32>
    %1 = vector.shape_cast %0 : vector<2x1x256xf32> to vector<2x256xf32>
    %c0_2 = arith.constant 0 : index
    %c1 = arith.constant 1 : index
    %c0_3 = arith.constant 0 : index
    %2 = vector.load %arg3[%c0_2, %c1, %c0_3] : memref<2x8x256xf32, #tpu.memory_space<vmem>>, vector<2x1x256xf32>
    %3 = vector.shape_cast %2 : vector<2x1x256xf32> to vector<2x256xf32>
    %4 = arith.maximumf %1, %3 : vector<2x256xf32>
    %5 = arith.addf %1, %3 : vector<2x256xf32>
    %c0_4 = arith.constant 0 : index
    %c2 = arith.constant 2 : index
    %c0_5 = arith.constant 0 : index
    %6 = vector.load %arg3[%c0_4, %c2, %c0_5] : memref<2x8x256xf32, #tpu.memory_space<vmem>>, vector<2x1x256xf32>
    %7 = vector.shape_cast %6 : vector<2x1x256xf32> to vector<2x256xf32>
    %8 = arith.maximumf %4, %7 : vector<2x256xf32>
    %9 = arith.addf %5, %7 : vector<2x256xf32>
    %c0_6 = arith.constant 0 : index
    %c3 = arith.constant 3 : index
    %c0_7 = arith.constant 0 : index
    %10 = vector.load %arg3[%c0_6, %c3, %c0_7] : memref<2x8x256xf32, #tpu.memory_space<vmem>>, vector<2x1x256xf32>
    %11 = vector.shape_cast %10 : vector<2x1x256xf32> to vector<2x256xf32>
    %12 = arith.maximumf %8, %11 : vector<2x256xf32>
    %13 = arith.addf %9, %11 : vector<2x256xf32>
    %c0_8 = arith.constant 0 : index
    %c4 = arith.constant 4 : index
    %c0_9 = arith.constant 0 : index
    %14 = vector.load %arg3[%c0_8, %c4, %c0_9] : memref<2x8x256xf32, #tpu.memory_space<vmem>>, vector<2x1x256xf32>
    %15 = vector.shape_cast %14 : vector<2x1x256xf32> to vector<2x256xf32>
    %16 = arith.maximumf %12, %15 : vector<2x256xf32>
    %17 = arith.addf %13, %15 : vector<2x256xf32>
    %c0_10 = arith.constant 0 : index
    %c5 = arith.constant 5 : index
    %c0_11 = arith.constant 0 : index
    %18 = vector.load %arg3[%c0_10, %c5, %c0_11] : memref<2x8x256xf32, #tpu.memory_space<vmem>>, vector<2x1x256xf32>
    %19 = vector.shape_cast %18 : vector<2x1x256xf32> to vector<2x256xf32>
    %20 = arith.maximumf %16, %19 : vector<2x256xf32>
    %21 = arith.addf %17, %19 : vector<2x256xf32>
    %c0_12 = arith.constant 0 : index
    %c6 = arith.constant 6 : index
    %c0_13 = arith.constant 0 : index
    %22 = vector.load %arg3[%c0_12, %c6, %c0_13] : memref<2x8x256xf32, #tpu.memory_space<vmem>>, vector<2x1x256xf32>
    %23 = vector.shape_cast %22 : vector<2x1x256xf32> to vector<2x256xf32>
    %24 = arith.maximumf %20, %23 : vector<2x256xf32>
    %25 = arith.addf %21, %23 : vector<2x256xf32>
    %c0_14 = arith.constant 0 : index
    %c7 = arith.constant 7 : index
    %c0_15 = arith.constant 0 : index
    %26 = vector.load %arg3[%c0_14, %c7, %c0_15] : memref<2x8x256xf32, #tpu.memory_space<vmem>>, vector<2x1x256xf32>
    %27 = vector.shape_cast %26 : vector<2x1x256xf32> to vector<2x256xf32>
    %28 = arith.maximumf %24, %27 : vector<2x256xf32>
    %29 = arith.addf %25, %27 : vector<2x256xf32>
    %c0_16 = arith.constant 0 : index
    %30 = memref.load %arg2[%c0_16] : memref<2xf32, #tpu.memory_space<smem>>
    %31 = vector.broadcast %30 : f32 to vector<2x256xf32>
    %32 = arith.mulf %31, %29 : vector<2x256xf32>
    %c1_17 = arith.constant 1 : index
    %33 = memref.load %arg2[%c1_17] : memref<2xf32, #tpu.memory_space<smem>>
    %34 = vector.broadcast %33 : f32 to vector<2x256xf32>
    %35 = arith.mulf %34, %28 : vector<2x256xf32>
    %36 = arith.addf %32, %35 : vector<2x256xf32>
    %cst = arith.constant 0.000000e+00 : f32
    %37 = vector.broadcast %cst : f32 to vector<2x256xf32>
    %38 = arith.maximumf %36, %37 : vector<2x256xf32>
    %c0_18 = arith.constant 0 : index
    %c0_19 = arith.constant 0 : index
    %39 = vector.load %arg4[%c0_18, %c0_19] : memref<2x256xf32, #tpu.memory_space<vmem>>, vector<2x256xf32>
    tpu.vector_store %arg4[%c0_18, %c0_19], %38 {strides = array<i32>} : memref<2x256xf32, #tpu.memory_space<vmem>>, vector<2x256xf32>,
    return
  }
  func.func @transform_0(%arg0: i32, %arg1: i32) -> i32 {
    %c0_i32 = arith.constant 0 : i32
    %c0_i32_0 = arith.constant 0 : i32
    return %c0_i32 : i32
  }
  func.func @transform_1(%arg0: i32, %arg1: i32) -> (i32, i32, i32) {
    %c0_i32 = arith.constant 0 : i32
    %c0_i32_0 = arith.constant 0 : i32
    return %arg0, %c0_i32, %arg1 : i32, i32, i32
  }
  func.func @transform_2(%arg0: i32, %arg1: i32) -> (i32, i32) {
    %c0_i32 = arith.constant 0 : i32
    return %arg0, %arg1 : i32, i32
  }
}

</mosaic_0001>

<bundles_post_ra>
// kernel: tpu_custom_call.1
= control target key start
LH: loop header
LB: loop body
LE: loop exit
PB: predicated region body
PF: predicated region fallthrough
CT: control target
= control target key end

     0   :  { %7 = vsyncpa [#allocation5], 0  ;;  %s245_s0 = inlined_call_operand.hbm [shape: f32[2], index: 0, kind: input, shape index: {}]   ;;  %s246_s1 = inlined_call_operand.hbm [shape: f32[2,8,256], index: 1, kind: input, shape index: {}]   ;;  %s247_s2 = inlined_call_operand.hbm [shape: f32[2,256], index: 2, kind: output, shape index: {}]  }
   0x1   :  { %8 = vsyncpa [#allocation3], 0 }
   0x2   :  { %9 = vsyncpa [#allocation4], 0  ;;  %s15_s11 = sshll.u32 %s245_s0, 4  ;;  %s23_s14 = sshll.u32 %s246_s1, 4  ;;  %s16_s11 = int_to_ptr.hbm [resolvable:$true] %s15_s11  ;;  %s24_s14 = int_to_ptr.hbm [resolvable:$true] %s23_s14 }
   0x3   :  { %s210_s15 = smov [#allocation2]   ;;  %s211_s16 = smov [#allocation6]  }
   0x4   :  { %18 = dma.hbm_to_smem %s16_s11, 16, %s210_s15, [#allocation5]  }
   0x5   :  { %s25_s17 = sshll.u32 %s211_s16, 4  ;;  %s212_s18 = smov 256   ;;  %s26_s17 = int_to_ptr.vmem [resolvable:$true] %s25_s17 }
   0x6   :  { %s213_s19 = smov 16  }
   0x7   :  { %31 = dma.hbm_to_vmem [thread:$0]  %s24_s14, 512, %s26_s17, [#allocation3], %s212_s18, %s212_s18, %s213_s19  }
   0x8   :  { %204 = dma.done.wait [#allocation5], 16  }
   0x9   :  { %205 = vsyncadd [#allocation5], 4294967280 }
   0xa   :  { %206 = dma.done.wait [#allocation3], 512  }
   0xb   :  { %207 = vsyncadd [#allocation3], 4294966784 }
   0xc   :  { %40 = sfence }
   0xd   :  { %v41_v0 = vld [vmem:[#allocation6] ss:$8 sm:$0x3]  ;;  %v45_v1 = vld [vmem:[#allocation6 + $0x1] ss:$8 sm:$0x3] }
   0xe   :  { %v48_v2 = vmax.f32 %v41_v0, %v45_v1  ;;  %v50_v3 = vadd.f32 %v45_v1, %v41_v0  ;;  %v53_v4 = vld [vmem:[#allocation6 + $0x2] ss:$8 sm:$0x3]  ;;  %v61_v5 = vld [vmem:[#allocation6 + $0x3] ss:$8 sm:$0x3] }
   0xf   :  { %v69_v8 = vld [vmem:[#allocation6 + $0x4] ss:$8 sm:$0x3]  ;;  %s236_s0 = sld [smem:[#allocation2]]  ;;  %s214_s20 = smov [#allocation7]  }
  0x10   :  { %v56_v6 = vmax.f32 %v48_v2, %v53_v4  ;;  %v58_v7 = vadd.f32 %v53_v4, %v50_v3  ;;  %v43_v9 = vld [vmem:[#allocation6 + $0x10] ss:$8 sm:$0x3]  ;;  %s238_s1 = sld [smem:[#allocation2 + $0x1]]  ;;  %s125_s21 = sshll.u32 %s214_s20, 4  ;;  %s126_s21 = int_to_ptr.vmem [resolvable:$true] %s125_s21 }
  0x11   :  { %v47_v12 = vld [vmem:[#allocation6 + $0x11] ss:$8 sm:$0x3]  ;;  %v77_v13 = vld [vmem:[#allocation6 + $0x5] ss:$8 sm:$0x3] }
  0x12   :  { %v64_v10 = vmax.f32 %v56_v6, %v61_v5  ;;  %v66_v11 = vadd.f32 %v61_v5, %v58_v7  ;;  %v49_v14 = vmax.f32 %v43_v9, %v47_v12  ;;  %v51_v15 = vadd.f32 %v47_v12, %v43_v9  ;;  %v55_v16 = vld [vmem:[#allocation6 + $0x12] ss:$8 sm:$0x3]  ;;  %v63_v19 = vld [vmem:[#allocation6 + $0x13] ss:$8 sm:$0x3] }
  0x13   :  { %v85_v20 = vld [vmem:[#allocation6 + $0x6] ss:$8 sm:$0x3]  ;;  %v71_v25 = vld [vmem:[#allocation6 + $0x14] ss:$8 sm:$0x3] }
  0x14   :  { %v72_v17 = vmax.f32 %v64_v10, %v69_v8  ;;  %v74_v18 = vadd.f32 %v69_v8, %v66_v11  ;;  %v57_v21 = vmax.f32 %v49_v14, %v55_v16  ;;  %v59_v22 = vadd.f32 %v55_v16, %v51_v15  ;;  %v93_v26 = vld [vmem:[#allocation6 + $0x7] ss:$8 sm:$0x3]  ;;  %v79_v31 = vld [vmem:[#allocation6 + $0x15] ss:$8 sm:$0x3] }
  0x15   :  { %v101_v32 = vstv %s236_s0  ;;  %v87_v38 = vld [vmem:[#allocation6 + $0x16] ss:$8 sm:$0x3]  ;;  %v95_v43 = vld [vmem:[#allocation6 + $0x17] ss:$8 sm:$0x3] }
  0x16   :  { %v80_v23 = vmax.f32 %v72_v17, %v77_v13  ;;  %v82_v24 = vadd.f32 %v77_v13, %v74_v18  ;;  %v65_v27 = vmax.f32 %v57_v21, %v63_v19  ;;  %v67_v28 = vadd.f32 %v63_v19, %v59_v22  ;;  %s127_s24 = sshll.u32 %s247_s2, 4  ;;  %s128_s24 = int_to_ptr.hbm [resolvable:$true] %s127_s24 }
  0x17   :  { %v105_v33 = vstv %s238_s1 }
  0x18   :  { %v88_v29 = vmax.f32 %v80_v23, %v85_v20  ;;  %v90_v30 = vadd.f32 %v85_v20, %v82_v24  ;;  %v73_v34 = vmax.f32 %v65_v27, %v71_v25  ;;  %v75_v35 = vadd.f32 %v71_v25, %v67_v28 }
  0x1a   :  { %v96_v36 = vmax.f32 %v88_v29, %v93_v26  ;;  %v98_v37 = vadd.f32 %v93_v26, %v90_v30  ;;  %v81_v39 = vmax.f32 %v73_v34, %v79_v31  ;;  %v83_v40 = vadd.f32 %v79_v31, %v75_v35 }
  0x1c   :  { %v102_v41 = vmul.f32 %v101_v32, %v98_v37  ;;  %v106_v42 = vmul.f32 %v105_v33, %v96_v36  ;;  %v89_v44 = vmax.f32 %v81_v39, %v87_v38  ;;  %v91_v45 = vadd.f32 %v87_v38, %v83_v40 }
  0x1e   :  { %v108_v46 = vadd.f32 %v106_v42, %v102_v41  ;;  %v97_v47 = vmax.f32 %v89_v44, %v95_v43  ;;  %v99_v48 = vadd.f32 %v95_v43, %v91_v45 }
  0x20   :  { %v110_v49 = vmax.f32 %v108_v46, 0.0  ;;  %v103_v50 = vmul.f32 %v101_v32, %v99_v48  ;;  %v107_v51 = vmul.f32 %v105_v33, %v97_v47 }
  0x22   :  { %114 = vst [vmem:[#allocation1] ss:$2 sm:$0xff] %v110_v49  ;;  %v109_v52 = vadd.f32 %v107_v51, %v103_v50 }
  0x24   :  { %v111_v53 = vmax.f32 %v109_v52, 0.0 }
  0x26   :  { %116 = vst [vmem:[#allocation1 + $0x1] ss:$2 sm:$0xff] %v111_v53 }
  0x2d   :  { %v117_v54 = vld [vmem:[#allocation1] sm:$0xff] }
  0x2e   :  { %119 = vst [vmem:[#allocation7] sm:$0xf] %v117_v54 }
  0x2f   :  { %130 = dma.vmem_to_hbm [thread:$0]  %s126_s21, 64, %s128_s24, [#allocation4]  }
  0x30   :  { %208 = dma.done.wait [#allocation4], 64  }
  0x31   :  { %209 = vsyncadd [#allocation4], 4294967232 }
  0x32   :  { %135 = vsyncpa [#allocation3], 1 }
  0x33   :  { %136 = vsyncpa [#allocation4], 1 }
  0x34   :  { %137 = vsyncpa [#allocation5], 1 }

</bundles_post_ra>
